<compile_context>
chip_gen: v7x
topology: tpu7x:2x2x1
jax: 0.10.0
libtpu: 0.0.40
codegen_flags: <defaults>
</compile_context>

<pallas_src>
import jax
import jax.numpy as jnp
import numpy as np
from jax.experimental import pallas as pl
from jax.experimental.pallas import tpu as pltpu  # noqa: F401  (TPU backend)


# ---------------------------------------------------------------------------
# Fused Pallas kernel: full GCN forward
# ---------------------------------------------------------------------------
def _gcn_fused_kernel(a_ref, x_ref, w_ref, b_ref, fcw_ref, fcb_ref, o_ref):
    """Full forward in one kernel.

    a_ref   : (N, N)    normalized adjacency  D^{-1/2} (A + I) D^{-1/2}
    x_ref   : (N, D)    input node features
    w_ref   : (L, D, D) stacked GraphConv weights
    b_ref   : (L, 1, D) stacked GraphConv biases
    fcw_ref : (N, D, O) FC weight, laid out so fcw[n, d, o] == fc_w[o, n*D + d]
    fcb_ref : (1, O)    FC bias
    o_ref   : (1, O)    output logits
    """
    a = a_ref[...]
    x = x_ref[...]
    num_layers = w_ref.shape[0]

    # GraphConv(norm='both') + LeakyReLU per layer; X never leaves the chip.
    for l in range(num_layers):
        ax = jnp.dot(a, x, preferred_element_type=jnp.float32)
        h = jnp.dot(ax, w_ref[l], preferred_element_type=jnp.float32) + b_ref[l]
        x = jnp.where(h > 0, h, 0.01 * h)  # LeakyReLU (slope 0.01)

    # FC head = Sequential(Flatten, LeakyReLU, Linear).
    # NOTE: the reference module really applies LeakyReLU twice in a row
    # (once after the last layer, once inside the Sequential) — keep it.
    x = jnp.where(x > 0, x, 0.01 * x)

    # Linear over the row-major flattened X, written as a per-node
    # accumulation to avoid an in-kernel (N, D) -> (1, N*D) relayout.
    fcw = fcw_ref[...]
    acc = fcb_ref[...]
    for n in range(x.shape[0]):
        acc = acc + jnp.dot(x[n:n + 1, :], fcw[n],
                            preferred_element_type=jnp.float32)
    o_ref[...] = acc


# ---------------------------------------------------------------------------
# Wrapper
# ---------------------------------------------------------------------------
def gcn_forward(a_hat, feats, w_stack, b_stack, fc_w, fc_b):
    """Forward pass matching GCN.forward(g, F). Returns shape (out_dim,)."""
    n, d = feats.shape
    num_layers = w_stack.shape[0]
    out_dim = fc_w.shape[0]

    # One-time layout prep (outside the kernel): no fc_w.T, no flatten of X.
    fc_wr = fc_w.reshape(out_dim, n, d).transpose(1, 2, 0)   # (N, D, O)
    fc_b_row = fc_b.reshape(1, out_dim)
    b_stack = b_stack.reshape(num_layers, 1, d)

    flops = num_layers * (2 * n * n * d + 2 * n * d * d) + 2 * n * d * out_dim
    bytes_accessed = 4 * (n * n + n * d + num_layers * d * d
                          + num_layers * d + n * d * out_dim + 2 * out_dim)

    out = pl.pallas_call(
        _gcn_fused_kernel,
        out_shape=jax.ShapeDtypeStruct((1, out_dim), jnp.float32),
        in_specs=[
            pl.BlockSpec((n, n), lambda: (0, 0)),
            pl.BlockSpec((n, d), lambda: (0, 0)),
            pl.BlockSpec((num_layers, d, d), lambda: (0, 0, 0)),
            pl.BlockSpec((num_layers, 1, d), lambda: (0, 0, 0)),
            pl.BlockSpec((n, d, out_dim), lambda: (0, 0, 0)),
            pl.BlockSpec((1, out_dim), lambda: (0, 0)),
        ],
        out_specs=pl.BlockSpec((1, out_dim), lambda: (0, 0)),
        cost_estimate=pl.CostEstimate(flops=int(flops), transcendentals=0,
                                      bytes_accessed=int(bytes_accessed)),
    )(a_hat, feats, w_stack, b_stack, fc_wr, fc_b_row)
    return out[0]


# ---------------------------------------------------------------------------
# Pure-JAX reference (for correctness check)
# ---------------------------------------------------------------------------
def gcn_reference(a_hat, feats, w_stack, b_stack, fc_w, fc_b):
    x = feats
    for l in range(w_stack.shape[0]):
        h = a_hat @ x @ w_stack[l] + b_stack[l].reshape(1, -1)
        x = jnp.where(h > 0, h, 0.01 * h)
    x = jnp.where(x > 0, x, 0.01 * x)
    return x.reshape(-1) @ fc_w.T + fc_b


# ---------------------------------------------------------------------------
# Graph / parameter construction (plain JAX glue, outside the kernel)
# ---------------------------------------------------------------------------
def build_normalized_adjacency(key, n):
    """Random symmetric graph, add self loops, symmetric 'both' normalization."""
    logits = jax.random.uniform(key, (n, n))
    adj = (logits > 0.7).astype(jnp.float32)
    adj = jnp.maximum(adj, adj.T)                      # symmetric
    adj = adj * (1.0 - jnp.eye(n)) + jnp.eye(n)        # dgl.add_self_loop
    deg = jnp.sum(adj, axis=1)
    dinv_sqrt = 1.0 / jnp.sqrt(jnp.maximum(deg, 1.0))
    return dinv_sqrt[:, None] * adj * dinv_sqrt[None, :]


def xavier_uniform(key, shape):
    fan_in, fan_out = shape
    bound = float(np.sqrt(6.0 / (fan_in + fan_out)))
    return jax.random.uniform(key, shape, minval=-bound, maxval=bound,
                              dtype=jnp.float32)


if __name__ == "__main__":
    # Module hyper-parameters (small, consistent with the forward pass)
    in_dim = 32
    out_dim = 8
    graph_size = 16
    layer_num = 2

    key = jax.random.PRNGKey(0)
    k_graph, k_feat, k_fc, *k_layers = jax.random.split(key, 3 + layer_num)

    # Graph + input node features F: (graph_size, in_dim)
    a_hat = build_normalized_adjacency(k_graph, graph_size)
    feats = jax.random.normal(k_feat, (graph_size, in_dim), dtype=jnp.float32)

    # GraphConv parameters (xavier-uniform weights, zero biases), stacked.
    w_stack = jnp.stack([xavier_uniform(k_layers[i], (in_dim, in_dim))
                         for i in range(layer_num)])           # (L, D, D)
    b_stack = jnp.zeros((layer_num, 1, in_dim), dtype=jnp.float32)

    # FC head: Linear(in_dim * graph_size, out_dim), natural PyTorch layout.
    fc_in = in_dim * graph_size
    k_fc_w, k_fc_b = jax.random.split(k_fc)
    fc_bound = float(1.0 / np.sqrt(fc_in))
    fc_w = jax.random.uniform(k_fc_w, (out_dim, fc_in),
                              minval=-fc_bound, maxval=fc_bound, dtype=jnp.float32)
    fc_b = jax.random.uniform(k_fc_b, (out_dim,),
                              minval=-fc_bound, maxval=fc_bound, dtype=jnp.float32)

    out = gcn_forward(a_hat, feats, w_stack, b_stack, fc_w, fc_b)
    jax.block_until_ready(out)
    assert out.shape == (out_dim,)

    ref = gcn_reference(a_hat, feats, w_stack, b_stack, fc_w, fc_b)
    assert np.allclose(np.asarray(out), np.asarray(ref), atol=1e-4, rtol=1e-4), (
        np.asarray(out), np.asarray(ref))
    print("KERNEL_OK")
</pallas_src>

<mosaic_0001>
module attributes {stable_mosaic.version = 11 : i64} {
  func.func @_gcn_fused_kernel(%arg0: memref<16x16xf32, #tpu.memory_space<vmem>>, %arg1: memref<16x32xf32, #tpu.memory_space<vmem>>, %arg2: memref<2x32x32xf32, #tpu.memory_space<vmem>>, %arg3: memref<2x1x32xf32, #tpu.memory_space<vmem>>, %arg4: memref<16x32x8xf32, #tpu.memory_space<vmem>>, %arg5: memref<1x8xf32, #tpu.memory_space<vmem>>, %arg6: memref<1x8xf32, #tpu.memory_space<vmem>>) attributes {dimension_semantics = [], scalar_prefetch = 0 : i64, scratch_operands = 0 : i64, tpu.core_type = #tpu.core_type<tc>} {
    %c0 = arith.constant 0 : index
    %c0_0 = arith.constant 0 : index
    %0 = vector.load %arg0[%c0, %c0_0] : memref<16x16xf32, #tpu.memory_space<vmem>>, vector<16x16xf32>
    %c0_1 = arith.constant 0 : index
    %c0_2 = arith.constant 0 : index
    %1 = vector.load %arg1[%c0_1, %c0_2] : memref<16x32xf32, #tpu.memory_space<vmem>>, vector<16x32xf32>
    %cst = arith.constant dense<0.000000e+00> : vector<16x32xf32>
    %2 = tpu.matmul %0, %1, %cst {dimension_numbers = #tpu.dot_dimension_numbers<[1], [0], [0], [1], [0, 0, 1, 1], [], []>} : vector<16x16xf32>, vector<16x32xf32>, vector<16x32xf32> -> vector<16x32xf32>
    %c0_3 = arith.constant 0 : index
    %c0_4 = arith.constant 0 : index
    %c0_5 = arith.constant 0 : index
    %3 = vector.load %arg2[%c0_3, %c0_4, %c0_5] : memref<2x32x32xf32, #tpu.memory_space<vmem>>, vector<1x32x32xf32>
    %4 = vector.shape_cast %3 : vector<1x32x32xf32> to vector<32x32xf32>
    %cst_6 = arith.constant dense<0.000000e+00> : vector<16x32xf32>
    %5 = tpu.matmul %2, %4, %cst_6 {dimension_numbers = #tpu.dot_dimension_numbers<[1], [0], [0], [1], [0, 0, 1, 1], [], []>} : vector<16x32xf32>, vector<32x32xf32>, vector<16x32xf32> -> vector<16x32xf32>
    %c0_7 = arith.constant 0 : index
    %c0_8 = arith.constant 0 : index
    %c0_9 = arith.constant 0 : index
    %6 = vector.load %arg3[%c0_7, %c0_8, %c0_9] : memref<2x1x32xf32, #tpu.memory_space<vmem>>, vector<1x1x32xf32>
    %7 = vector.shape_cast %6 : vector<1x1x32xf32> to vector<1x32xf32>
    %8 = vector.broadcast %7 : vector<1x32xf32> to vector<16x32xf32>
    %9 = arith.addf %5, %8 : vector<16x32xf32>
    %cst_10 = arith.constant 0.000000e+00 : f32
    %10 = vector.broadcast %cst_10 : f32 to vector<16x32xf32>
    %11 = arith.cmpf ogt, %9, %10 : vector<16x32xf32>
    %cst_11 = arith.constant 0.00999999977 : f32
    %12 = vector.broadcast %cst_11 : f32 to vector<16x32xf32>
    %13 = arith.mulf %12, %9 : vector<16x32xf32>
    %14 = arith.select %11, %9, %13 : vector<16x32xi1>, vector<16x32xf32>
    %cst_12 = arith.constant dense<0.000000e+00> : vector<16x32xf32>
    %15 = tpu.matmul %0, %14, %cst_12 {dimension_numbers = #tpu.dot_dimension_numbers<[1], [0], [0], [1], [0, 0, 1, 1], [], []>} : vector<16x16xf32>, vector<16x32xf32>, vector<16x32xf32> -> vector<16x32xf32>
    %c1 = arith.constant 1 : index
    %c0_13 = arith.constant 0 : index
    %c0_14 = arith.constant 0 : index
    %16 = vector.load %arg2[%c1, %c0_13, %c0_14] : memref<2x32x32xf32, #tpu.memory_space<vmem>>, vector<1x32x32xf32>
    %17 = vector.shape_cast %16 : vector<1x32x32xf32> to vector<32x32xf32>
    %cst_15 = arith.constant dense<0.000000e+00> : vector<16x32xf32>
    %18 = tpu.matmul %15, %17, %cst_15 {dimension_numbers = #tpu.dot_dimension_numbers<[1], [0], [0], [1], [0, 0, 1, 1], [], []>} : vector<16x32xf32>, vector<32x32xf32>, vector<16x32xf32> -> vector<16x32xf32>
    %c1_16 = arith.constant 1 : index
    %c0_17 = arith.constant 0 : index
    %c0_18 = arith.constant 0 : index
    %19 = vector.load %arg3[%c1_16, %c0_17, %c0_18] : memref<2x1x32xf32, #tpu.memory_space<vmem>>, vector<1x1x32xf32>
    %20 = vector.shape_cast %19 : vector<1x1x32xf32> to vector<1x32xf32>
    %21 = vector.broadcast %20 : vector<1x32xf32> to vector<16x32xf32>
    %22 = arith.addf %18, %21 : vector<16x32xf32>
    %cst_19 = arith.constant 0.000000e+00 : f32
    %23 = vector.broadcast %cst_19 : f32 to vector<16x32xf32>
    %24 = arith.cmpf ogt, %22, %23 : vector<16x32xf32>
    %cst_20 = arith.constant 0.00999999977 : f32
    %25 = vector.broadcast %cst_20 : f32 to vector<16x32xf32>
    %26 = arith.mulf %25, %22 : vector<16x32xf32>
    %27 = arith.select %24, %22, %26 : vector<16x32xi1>, vector<16x32xf32>
    %cst_21 = arith.constant 0.000000e+00 : f32
    %28 = vector.broadcast %cst_21 : f32 to vector<16x32xf32>
    %29 = arith.cmpf ogt, %27, %28 : vector<16x32xf32>
    %cst_22 = arith.constant 0.00999999977 : f32
    %30 = vector.broadcast %cst_22 : f32 to vector<16x32xf32>
    %31 = arith.mulf %30, %27 : vector<16x32xf32>
    %32 = arith.select %29, %27, %31 : vector<16x32xi1>, vector<16x32xf32>
    %c0_23 = arith.constant 0 : index
    %c0_24 = arith.constant 0 : index
    %c0_25 = arith.constant 0 : index
    %33 = vector.load %arg4[%c0_23, %c0_24, %c0_25] : memref<16x32x8xf32, #tpu.memory_space<vmem>>, vector<16x32x8xf32>
    %c0_26 = arith.constant 0 : index
    %c0_27 = arith.constant 0 : index
    %34 = vector.load %arg5[%c0_26, %c0_27] : memref<1x8xf32, #tpu.memory_space<vmem>>, vector<1x8xf32>
    %35 = vector.extract_strided_slice %32 {offsets = [0, 0], sizes = [1, 32], strides = [1, 1]} : vector<16x32xf32> to vector<1x32xf32>
    %36 = vector.extract_strided_slice %33 {offsets = [0, 0, 0], sizes = [1, 32, 8], strides = [1, 1, 1]} : vector<16x32x8xf32> to vector<1x32x8xf32>
    %37 = vector.shape_cast %36 : vector<1x32x8xf32> to vector<32x8xf32>
    %cst_28 = arith.constant dense<0.000000e+00> : vector<1x8xf32>
    %38 = tpu.matmul %35, %37, %cst_28 {dimension_numbers = #tpu.dot_dimension_numbers<[1], [0], [0], [1], [0, 0, 1, 1], [], []>} : vector<1x32xf32>, vector<32x8xf32>, vector<1x8xf32> -> vector<1x8xf32>
    %39 = arith.addf %34, %38 : vector<1x8xf32>
    %40 = vector.extract_strided_slice %32 {offsets = [1, 0], sizes = [1, 32], strides = [1, 1]} : vector<16x32xf32> to vector<1x32xf32>
    %41 = vector.extract_strided_slice %33 {offsets = [1, 0, 0], sizes = [1, 32, 8], strides = [1, 1, 1]} : vector<16x32x8xf32> to vector<1x32x8xf32>
    %42 = vector.shape_cast %41 : vector<1x32x8xf32> to vector<32x8xf32>
    %cst_29 = arith.constant dense<0.000000e+00> : vector<1x8xf32>
    %43 = tpu.matmul %40, %42, %cst_29 {dimension_numbers = #tpu.dot_dimension_numbers<[1], [0], [0], [1], [0, 0, 1, 1], [], []>} : vector<1x32xf32>, vector<32x8xf32>, vector<1x8xf32> -> vector<1x8xf32>
    %44 = arith.addf %39, %43 : vector<1x8xf32>
    %45 = vector.extract_strided_slice %32 {offsets = [2, 0], sizes = [1, 32], strides = [1, 1]} : vector<16x32xf32> to vector<1x32xf32>
    %46 = vector.extract_strided_slice %33 {offsets = [2, 0, 0], sizes = [1, 32, 8], strides = [1, 1, 1]} : vector<16x32x8xf32> to vector<1x32x8xf32>
    %47 = vector.shape_cast %46 : vector<1x32x8xf32> to vector<32x8xf32>
    %cst_30 = arith.constant dense<0.000000e+00> : vector<1x8xf32>
    %48 = tpu.matmul %45, %47, %cst_30 {dimension_numbers = #tpu.dot_dimension_numbers<[1], [0], [0], [1], [0, 0, 1, 1], [], []>} : vector<1x32xf32>, vector<32x8xf32>, vector<1x8xf32> -> vector<1x8xf32>
    %49 = arith.addf %44, %48 : vector<1x8xf32>
    %50 = vector.extract_strided_slice %32 {offsets = [3, 0], sizes = [1, 32], strides = [1, 1]} : vector<16x32xf32> to vector<1x32xf32>
    %51 = vector.extract_strided_slice %33 {offsets = [3, 0, 0], sizes = [1, 32, 8], strides = [1, 1, 1]} : vector<16x32x8xf32> to vector<1x32x8xf32>
    %52 = vector.shape_cast %51 : vector<1x32x8xf32> to vector<32x8xf32>
    %cst_31 = arith.constant dense<0.000000e+00> : vector<1x8xf32>
    %53 = tpu.matmul %50, %52, %cst_31 {dimension_numbers = #tpu.dot_dimension_numbers<[1], [0], [0], [1], [0, 0, 1, 1], [], []>} : vector<1x32xf32>, vector<32x8xf32>, vector<1x8xf32> -> vector<1x8xf32>
    %54 = arith.addf %49, %53 : vector<1x8xf32>
    %55 = vector.extract_strided_slice %32 {offsets = [4, 0], sizes = [1, 32], strides = [1, 1]} : vector<16x32xf32> to vector<1x32xf32>
    %56 = vector.extract_strided_slice %33 {offsets = [4, 0, 0], sizes = [1, 32, 8], strides = [1, 1, 1]} : vector<16x32x8xf32> to vector<1x32x8xf32>
    %57 = vector.shape_cast %56 : vector<1x32x8xf32> to vector<32x8xf32>
    %cst_32 = arith.constant dense<0.000000e+00> : vector<1x8xf32>
    %58 = tpu.matmul %55, %57, %cst_32 {dimension_numbers = #tpu.dot_dimension_numbers<[1], [0], [0], [1], [0, 0, 1, 1], [], []>} : vector<1x32xf32>, vector<32x8xf32>, vector<1x8xf32> -> vector<1x8xf32>
    %59 = arith.addf %54, %58 : vector<1x8xf32>
    %60 = vector.extract_strided_slice %32 {offsets = [5, 0], sizes = [1, 32], strides = [1, 1]} : vector<16x32xf32> to vector<1x32xf32>
    %61 = vector.extract_strided_slice %33 {offsets = [5, 0, 0], sizes = [1, 32, 8], strides = [1, 1, 1]} : vector<16x32x8xf32> to vector<1x32x8xf32>
    %62 = vector.shape_cast %61 : vector<1x32x8xf32> to vector<32x8xf32>
    %cst_33 = arith.constant dense<0.000000e+00> : vector<1x8xf32>
    %63 = tpu.matmul %60, %62, %cst_33 {dimension_numbers = #tpu.dot_dimension_numbers<[1], [0], [0], [1], [0, 0, 1, 1], [], []>} : vector<1x32xf32>, vector<32x8xf32>, vector<1x8xf32> -> vector<1x8xf32>
    %64 = arith.addf %59, %63 : vector<1x8xf32>
    %65 = vector.extract_strided_slice %32 {offsets = [6, 0], sizes = [1, 32], strides = [1, 1]} : vector<16x32xf32> to vector<1x32xf32>
    %66 = vector.extract_strided_slice %33 {offsets = [6, 0, 0], sizes = [1, 32, 8], strides = [1, 1, 1]} : vector<16x32x8xf32> to vector<1x32x8xf32>
    %67 = vector.shape_cast %66 : vector<1x32x8xf32> to vector<32x8xf32>
    %cst_34 = arith.constant dense<0.000000e+00> : vector<1x8xf32>
    %68 = tpu.matmul %65, %67, %cst_34 {dimension_numbers = #tpu.dot_dimension_numbers<[1], [0], [0], [1], [0, 0, 1, 1], [], []>} : vector<1x32xf32>, vector<32x8xf32>, vector<1x8xf32> -> vector<1x8xf32>
    %69 = arith.addf %64, %68 : vector<1x8xf32>
    %70 = vector.extract_strided_slice %32 {offsets = [7, 0], sizes = [1, 32], strides = [1, 1]} : vector<16x32xf32> to vector<1x32xf32>
    %71 = vector.extract_strided_slice %33 {offsets = [7, 0, 0], sizes = [1, 32, 8], strides = [1, 1, 1]} : vector<16x32x8xf32> to vector<1x32x8xf32>
    %72 = vector.shape_cast %71 : vector<1x32x8xf32> to vector<32x8xf32>
    %cst_35 = arith.constant dense<0.000000e+00> : vector<1x8xf32>
    %73 = tpu.matmul %70, %72, %cst_35 {dimension_numbers = #tpu.dot_dimension_numbers<[1], [0], [0], [1], [0, 0, 1, 1], [], []>} : vector<1x32xf32>, vector<32x8xf32>, vector<1x8xf32> -> vector<1x8xf32>
    %74 = arith.addf %69, %73 : vector<1x8xf32>
    %75 = vector.extract_strided_slice %32 {offsets = [8, 0], sizes = [1, 32], strides = [1, 1]} : vector<16x32xf32> to vector<1x32xf32>
    %76 = vector.extract_strided_slice %33 {offsets = [8, 0, 0], sizes = [1, 32, 8], strides = [1, 1, 1]} : vector<16x32x8xf32> to vector<1x32x8xf32>
    %77 = vector.shape_cast %76 : vector<1x32x8xf32> to vector<32x8xf32>
    %cst_36 = arith.constant dense<0.000000e+00> : vector<1x8xf32>
    %78 = tpu.matmul %75, %77, %cst_36 {dimension_numbers = #tpu.dot_dimension_numbers<[1], [0], [0], [1], [0, 0, 1, 1], [], []>} : vector<1x32xf32>, vector<32x8xf32>, vector<1x8xf32> -> vector<1x8xf32>
    %79 = arith.addf %74, %78 : vector<1x8xf32>
    %80 = vector.extract_strided_slice %32 {offsets = [9, 0], sizes = [1, 32], strides = [1, 1]} : vector<16x32xf32> to vector<1x32xf32>
    %81 = vector.extract_strided_slice %33 {offsets = [9, 0, 0], sizes = [1, 32, 8], strides = [1, 1, 1]} : vector<16x32x8xf32> to vector<1x32x8xf32>
    %82 = vector.shape_cast %81 : vector<1x32x8xf32> to vector<32x8xf32>
    %cst_37 = arith.constant dense<0.000000e+00> : vector<1x8xf32>
    %83 = tpu.matmul %80, %82, %cst_37 {dimension_numbers = #tpu.dot_dimension_numbers<[1], [0], [0], [1], [0, 0, 1, 1], [], []>} : vector<1x32xf32>, vector<32x8xf32>, vector<1x8xf32> -> vector<1x8xf32>
    %84 = arith.addf %79, %83 : vector<1x8xf32>
    %85 = vector.extract_strided_slice %32 {offsets = [10, 0], sizes = [1, 32], strides = [1, 1]} : vector<16x32xf32> to vector<1x32xf32>
    %86 = vector.extract_strided_slice %33 {offsets = [10, 0, 0], sizes = [1, 32, 8], strides = [1, 1, 1]} : vector<16x32x8xf32> to vector<1x32x8xf32>
    %87 = vector.shape_cast %86 : vector<1x32x8xf32> to vector<32x8xf32>
    %cst_38 = arith.constant dense<0.000000e+00> : vector<1x8xf32>
    %88 = tpu.matmul %85, %87, %cst_38 {dimension_numbers = #tpu.dot_dimension_numbers<[1], [0], [0], [1], [0, 0, 1, 1], [], []>} : vector<1x32xf32>, vector<32x8xf32>, vector<1x8xf32> -> vector<1x8xf32>
    %89 = arith.addf %84, %88 : vector<1x8xf32>
    %90 = vector.extract_strided_slice %32 {offsets = [11, 0], sizes = [1, 32], strides = [1, 1]} : vector<16x32xf32> to vector<1x32xf32>
    %91 = vector.extract_strided_slice %33 {offsets = [11, 0, 0], sizes = [1, 32, 8], strides = [1, 1, 1]} : vector<16x32x8xf32> to vector<1x32x8xf32>
    %92 = vector.shape_cast %91 : vector<1x32x8xf32> to vector<32x8xf32>
    %cst_39 = arith.constant dense<0.000000e+00> : vector<1x8xf32>
    %93 = tpu.matmul %90, %92, %cst_39 {dimension_numbers = #tpu.dot_dimension_numbers<[1], [0], [0], [1], [0, 0, 1, 1], [], []>} : vector<1x32xf32>, vector<32x8xf32>, vector<1x8xf32> -> vector<1x8xf32>
    %94 = arith.addf %89, %93 : vector<1x8xf32>
    %95 = vector.extract_strided_slice %32 {offsets = [12, 0], sizes = [1, 32], strides = [1, 1]} : vector<16x32xf32> to vector<1x32xf32>
    %96 = vector.extract_strided_slice %33 {offsets = [12, 0, 0], sizes = [1, 32, 8], strides = [1, 1, 1]} : vector<16x32x8xf32> to vector<1x32x8xf32>
    %97 = vector.shape_cast %96 : vector<1x32x8xf32> to vector<32x8xf32>
    %cst_40 = arith.constant dense<0.000000e+00> : vector<1x8xf32>
    %98 = tpu.matmul %95, %97, %cst_40 {dimension_numbers = #tpu.dot_dimension_numbers<[1], [0], [0], [1], [0, 0, 1, 1], [], []>} : vector<1x32xf32>, vector<32x8xf32>, vector<1x8xf32> -> vector<1x8xf32>
    %99 = arith.addf %94, %98 : vector<1x8xf32>
    %100 = vector.extract_strided_slice %32 {offsets = [13, 0], sizes = [1, 32], strides = [1, 1]} : vector<16x32xf32> to vector<1x32xf32>
    %101 = vector.extract_strided_slice %33 {offsets = [13, 0, 0], sizes = [1, 32, 8], strides = [1, 1, 1]} : vector<16x32x8xf32> to vector<1x32x8xf32>
    %102 = vector.shape_cast %101 : vector<1x32x8xf32> to vector<32x8xf32>
    %cst_41 = arith.constant dense<0.000000e+00> : vector<1x8xf32>
    %103 = tpu.matmul %100, %102, %cst_41 {dimension_numbers = #tpu.dot_dimension_numbers<[1], [0], [0], [1], [0, 0, 1, 1], [], []>} : vector<1x32xf32>, vector<32x8xf32>, vector<1x8xf32> -> vector<1x8xf32>
    %104 = arith.addf %99, %103 : vector<1x8xf32>
    %105 = vector.extract_strided_slice %32 {offsets = [14, 0], sizes = [1, 32], strides = [1, 1]} : vector<16x32xf32> to vector<1x32xf32>
    %106 = vector.extract_strided_slice %33 {offsets = [14, 0, 0], sizes = [1, 32, 8], strides = [1, 1, 1]} : vector<16x32x8xf32> to vector<1x32x8xf32>
    %107 = vector.shape_cast %106 : vector<1x32x8xf32> to vector<32x8xf32>
    %cst_42 = arith.constant dense<0.000000e+00> : vector<1x8xf32>
    %108 = tpu.matmul %105, %107, %cst_42 {dimension_numbers = #tpu.dot_dimension_numbers<[1], [0], [0], [1], [0, 0, 1, 1], [], []>} : vector<1x32xf32>, vector<32x8xf32>, vector<1x8xf32> -> vector<1x8xf32>
    %109 = arith.addf %104, %108 : vector<1x8xf32>
    %110 = vector.extract_strided_slice %32 {offsets = [15, 0], sizes = [1, 32], strides = [1, 1]} : vector<16x32xf32> to vector<1x32xf32>
    %111 = vector.extract_strided_slice %33 {offsets = [15, 0, 0], sizes = [1, 32, 8], strides = [1, 1, 1]} : vector<16x32x8xf32> to vector<1x32x8xf32>
    %112 = vector.shape_cast %111 : vector<1x32x8xf32> to vector<32x8xf32>
    %cst_43 = arith.constant dense<0.000000e+00> : vector<1x8xf32>
    %113 = tpu.matmul %110, %112, %cst_43 {dimension_numbers = #tpu.dot_dimension_numbers<[1], [0], [0], [1], [0, 0, 1, 1], [], []>} : vector<1x32xf32>, vector<32x8xf32>, vector<1x8xf32> -> vector<1x8xf32>
    %114 = arith.addf %109, %113 : vector<1x8xf32>
    %c0_44 = arith.constant 0 : index
    %c0_45 = arith.constant 0 : index
    %115 = vector.load %arg6[%c0_44, %c0_45] : memref<1x8xf32, #tpu.memory_space<vmem>>, vector<1x8xf32>
    tpu.vector_store %arg6[%c0_44, %c0_45], %114 {strides = array<i32>} : memref<1x8xf32, #tpu.memory_space<vmem>>, vector<1x8xf32>,
    return
  }
}

</mosaic_0001>

<bundles_post_ra>
// kernel: tpu_custom_call.1
= control target key start
LH: loop header
LB: loop body
LE: loop exit
PB: predicated region body
PF: predicated region fallthrough
CT: control target
= control target key end

     0   :  { %vm28_vm0 = vcmask 130048   ;;  %s2572_s0 = inlined_call_operand.vmem [shape: f32[16,16], index: 0, kind: input, shape index: {}]   ;;  %s2573_s1 = inlined_call_operand.vmem [shape: f32[16,32], index: 1, kind: input, shape index: {}]   ;;  %s2574_s2 = inlined_call_operand.vmem [shape: f32[2,32,32], index: 2, kind: input, shape index: {}]   ;;  %s2575_s3 = inlined_call_operand.vmem [shape: f32[2,1,32], index: 3, kind: input, shape index: {}]   ;;  %s2576_s4 = inlined_call_operand.vmem [shape: f32[16,32,8], index: 4, kind: input, shape index: {}]   ;;  %s2577_s5 = inlined_call_operand.vmem [shape: f32[1,8], index: 5, kind: input, shape index: {}]   ;;  %s2578_s6 = inlined_call_operand.hbm [shape: f32[1,8], index: 6, kind: output, shape index: {}]  }
   0x1   :  { %v26_v0 = vld [vmem:[%s2573_s1] sm:$0xff]  ;;  %v27_v1 = vld [vmem:[%s2573_s1 + $0x8] sm:$0xff]  ;;  %v112_v7 = vld [vmem:[%s2574_s2 + $0x10] sm:$0xff] }
   0x2   :  { %v24_v2 = vld [vmem:[%s2572_s0] sm:$0xff]  ;;  %v1998_v3 = vpack.c.bf16 %v27_v1, %v26_v0  ;;  %v111_v5 = vld [vmem:[%s2574_s2 + $0x8] sm:$0xff]  ;;  %v113_v8 = vld [vmem:[%s2574_s2 + $0x18] sm:$0xff] }
   0x3   :  { %1790 = vmatprep.mubr.msk.f32.mxu0 %vm28_vm0, %v24_v2  ;;  %v110_v4 = vld [vmem:[%s2574_s2] sm:$0xff] }
   0x4   :  { %v2002_v6 = vpack.c.bf16 %v111_v5, %v110_v4 }
   0x5   :  { %11 = vsyncpa [#allocation3], 0  ;;  %1999 = vmatprep.subr.bf16.mxu0 %v1998_v3  ;;  %v25_v9 = vld [vmem:[%s2572_s0 + $0x8] sm:$0xff]  ;;  %v2006_v10 = vpack.c.bf16 %v113_v8, %v112_v7  ;;  %vm121_vm1 = vcmask 261120   ;;  %v1657_v13 = vld [vmem:[%s2575_s3] ss:$0 sm:$0xff] }
   0x6   :  { %2001 = vmatpush3.bf16.msra.mxu0 %v1998_v3  ;;  %v1662_v20 = vld [vmem:[%s2574_s2 + $0x20] sm:$0xff]  ;;  %v1663_v21 = vld [vmem:[%s2574_s2 + $0x28] sm:$0xff]  ;;  %v1664_v26 = vld [vmem:[%s2574_s2 + $0x30] sm:$0xff]  ;;  %v2176_v34 = vmov 0.0|0.0   ;;  %vm2177_vm4 = vmmov 0   ;;  %v2178_v44 = vmov 0.0  }
   0x7   :  { %2003 = vmatprep.subr.bf16.mxu0 %v2002_v6  ;;  %v2014_v25 = vpack.c.bf16 %v1663_v21, %v1662_v20  ;;  %v1665_v27 = vld [vmem:[%s2574_s2 + $0x38] sm:$0xff]  ;;  %v390_v31 = vld [vmem:[%s2576_s4] sm:$0xff]  ;;  %v391_v32 = vld [vmem:[%s2576_s4 + $0x8] sm:$0xff]  ;;  %2058 = vmatprep.subr.bf16.mxu1 %v2176_v34  ;;  %vm1639_vm9 = vcmask 57344  }
   0x8   :  { %v2018_v28 = vpack.c.bf16 %v1665_v27, %v1664_v26  ;;  %v2023_v33 = vpack.c.bf16 %v391_v32, %v390_v31  ;;  %v414_v35 = vld [vmem:[%s2576_s4 + $0xc0] sm:$0xff]  ;;  %v415_v36 = vld [vmem:[%s2576_s4 + $0xc8] sm:$0xff]  ;;  %v392_v38 = vld [vmem:[%s2576_s4 + $0x10] sm:$0xff]  ;;  %1896 = vmatprep.mubr.msk.f32.mxu1 %vm2177_vm4, %v2178_v44 }
   0x9   :  { %1791 = vmatmul.mubr.msk.f32.vlgmr.msra.gmra.mrb[0].mxu0 %vm28_vm0, %v25_v9  ;;  %v2059_v37 = vpack.c.bf16 %v415_v36, %v414_v35  ;;  %v393_v39 = vld [vmem:[%s2576_s4 + $0x18] sm:$0xff]  ;;  %v416_v41 = vld [vmem:[%s2576_s4 + $0xd0] sm:$0xff]  ;;  %v1667_v45 = vld [vmem:[%s2575_s3 + $0x1] ss:$0 sm:$0xff] }
   0xa   :  { %2005 = vmatpush3.bf16.msra.mxu0 %v2002_v6  ;;  %v2026_v40 = vpack.c.bf16 %v393_v39, %v392_v38  ;;  %v417_v42 = vld [vmem:[%s2576_s4 + $0xd8] sm:$0xff]  ;;  %v394_v50 = vld [vmem:[%s2576_s4 + $0x20] sm:$0xff]  ;;  %v395_v51 = vld [vmem:[%s2576_s4 + $0x28] sm:$0xff] }
   0xb   :  { %2007 = vmatprep.subr.bf16.mxu0 %v2006_v10  ;;  %2060 = vmatpush3.bf16.msra.mxu1 %v2059_v37  ;;  %v2062_v43 = vpack.c.bf16 %v417_v42, %v416_v41  ;;  %v418_v53 = vld [vmem:[%s2576_s4 + $0xe0] sm:$0xff]  ;;  %v419_v54 = vld [vmem:[%s2576_s4 + $0xe8] sm:$0xff]  ;;  %v2029_v56 = vpack.c.bf16 %v395_v51, %v394_v50  ;;  %v396_v57 = vld [vmem:[%s2576_s4 + $0x30] sm:$0xff] }
   0xc   :  { %2061 = vmatprep.subr.bf16.mxu1 %v2176_v34  ;;  %v397_v58 = vld [vmem:[%s2576_s4 + $0x38] sm:$0xff]  ;;  %v2065_v60 = vpack.c.bf16 %v419_v54, %v418_v53  ;;  %v420_v62 = vld [vmem:[%s2576_s4 + $0xf0] sm:$0xff]  ;;  %v399_v3 = vld [vmem:[%s2576_s4 + $0x48] sm:$0xff] }
   0xd   :  { %v421_v63 = vld [vmem:[%s2576_s4 + $0xf8] sm:$0xff]  ;;  %v2032_v0 = vpack.c.bf16 %v397_v58, %v396_v57  ;;  %v422_v5 = vld [vmem:[%s2576_s4 + $0x100] sm:$0xff]  ;;  %v423_v6 = vld [vmem:[%s2576_s4 + $0x108] sm:$0xff] }
   0xe   :  { %2009 = vmatpush3.bf16.msra.mxu0 %v2006_v10  ;;  %v2068_v4 = vpack.c.bf16 %v421_v63, %v420_v62  ;;  %v400_v10 = vld [vmem:[%s2576_s4 + $0x50] sm:$0xff]  ;;  %v426_v21 = vld [vmem:[%s2576_s4 + $0x120] sm:$0xff]  ;;  %v405_v27 = vld [vmem:[%s2576_s4 + $0x78] sm:$0xff] }
   0xf   :  { %2063 = vmatpush3.bf16.msra.mxu1 %v2062_v43  ;;  %v404_v26 = vld [vmem:[%s2576_s4 + $0x70] sm:$0xff]  ;;  %v407_v35 = vld [vmem:[%s2576_s4 + $0x88] sm:$0xff]  ;;  %v430_v37 = vld [vmem:[%s2576_s4 + $0x140] sm:$0xff] }
  0x10   :  { %2064 = vmatprep.subr.bf16.mxu1 %v2176_v34  ;;  %v2044_v32 = vpack.c.bf16 %v405_v27, %v404_v26  ;;  %v431_v38 = vld [vmem:[%s2576_s4 + $0x148] sm:$0xff]  ;;  %v408_v41 = vld [vmem:[%s2576_s4 + $0x90] sm:$0xff]  ;;  %v409_v42 = vld [vmem:[%s2576_s4 + $0x98] sm:$0xff] }
  0x11   :  { %v2083_v43 = vpack.c.bf16 %v431_v38, %v430_v37  ;;  %v411_v50 = vld [vmem:[%s2576_s4 + $0xa8] sm:$0xff]  ;;  %v413_v57 = vld [vmem:[%s2576_s4 + $0xb8] sm:$0xff]  ;;  %v452_v26 = vld [vmem:[%s2576_s4 + $0x1f0] sm:$0xff] }
  0x12   :  { %v435_v53 = vld [vmem:[%s2576_s4 + $0x168] sm:$0xff]  ;;  %v437_v62 = vld [vmem:[%s2576_s4 + $0x178] sm:$0xff] }
  0x13   :  { %v453_v27 = vld [vmem:[%s2576_s4 + $0x1f8] sm:$0xff] }
  0xdc   :  { %v1792_v11 = vpop.f32.mrb[0].mxu0 }
  0xdd   :  { %v101_v12 = vpop.f32.mrb[1].mxu0 }
  0xde   :  { %1801 = vmatprep.mubr.msk.f32.mxu0 %vm121_vm1, %v101_v12  ;;  %v2071_v12 = vpack.c.bf16 %v423_v6, %v422_v5  ;;  %v440_v6 = vld [vmem:[%s2576_s4 + $0x190] sm:$0xff] }
  0xdf   :  { %1802 = vmatmul.mubr.msk.f32.vlgmr.msra.gmra.mrb[2].mxu0 %vm121_vm1, %v1792_v11  ;;  %v401_v11 = vld [vmem:[%s2576_s4 + $0x58] sm:$0xff] }
  0xe0   :  { %1808 = vmatprep.mubr.msk.f32.mxu0 %vm28_vm0, %v24_v2  ;;  %v398_v2 = vld [vmem:[%s2576_s4 + $0x40] sm:$0xff] }
  0xe1   :  { %v2035_v7 = vpack.c.bf16 %v399_v3, %v398_v2  ;;  %v439_v2 = vld [vmem:[%s2576_s4 + $0x188] sm:$0xff] }
 0x1b2   :  { %v1803_v14 = vpop.f32.mrb[2].mxu0 }
 0x1b3   :  { %v200_v15 = vadd.f32 %v1803_v14, %v1657_v13  ;;  %v194_v16 = vpop.f32.mrb[3].mxu0  ;;  %v424_v14 = vld [vmem:[%s2576_s4 + $0x110] sm:$0xff] }
 0x1b4   :  { %v195_v17 = vadd.f32 %v1657_v13, %v194_v16  ;;  %v2038_v16 = vpack.c.bf16 %v401_v11, %v400_v10 }
 0x1b5   :  { %vm204_vm2 = vcmp.gt.f32.partialorder %v200_v15, 0.0  ;;  %v206_v18 = vmul.f32 0.01, %v200_v15 }
 0x1b6   :  { %vm203_vm3 = vcmp.gt.f32.partialorder %v195_v17, 0.0  ;;  %v205_v19 = vmul.f32 0.01, %v195_v17 }
 0x1b7   :  { %v208_v22 = vsel %vm204_vm2, %v200_v15, %v206_v18  ;;  %v425_v15 = vld [vmem:[%s2576_s4 + $0x118] sm:$0xff]  ;;  %v402_v18 = vld [vmem:[%s2576_s4 + $0x60] sm:$0xff] }
 0x1b8   :  { %v207_v23 = vsel %vm203_vm3, %v195_v17, %v205_v19  ;;  %v403_v19 = vld [vmem:[%s2576_s4 + $0x68] sm:$0xff]  ;;  %v2074_v20 = vpack.c.bf16 %v425_v15, %v424_v14  ;;  %v446_v15 = vld [vmem:[%s2576_s4 + $0x1c0] sm:$0xff] }
 0x1b9   :  { %v2010_v24 = vpack.c.bf16 %v208_v22, %v207_v23  ;;  %v427_v22 = vld [vmem:[%s2576_s4 + $0x128] sm:$0xff] }
 0x1bb   :  { %2011 = vmatprep.subr.bf16.mxu0 %v2010_v24 }
 0x1bc   :  { %2013 = vmatpush3.bf16.msra.mxu0 %v2010_v24  ;;  %v2041_v24 = vpack.c.bf16 %v403_v19, %v402_v18  ;;  %v448_v19 = vld [vmem:[%s2576_s4 + $0x1d0] sm:$0xff] }
 0x1bd   :  { %2015 = vmatprep.subr.bf16.mxu0 %v2014_v25 }
 0x1bf   :  { %1809 = vmatmul.mubr.msk.f32.vlgmr.msra.gmra.mrb[4].mxu0 %vm28_vm0, %v25_v9 }
 0x1c0   :  { %2017 = vmatpush3.bf16.msra.mxu0 %v2014_v25 }
 0x1c1   :  { %2019 = vmatprep.subr.bf16.mxu0 %v2018_v28 }
 0x1c4   :  { %2021 = vmatpush3.bf16.msra.mxu0 %v2018_v28  ;;  %v2077_v28 = vpack.c.bf16 %v427_v22, %v426_v21  ;;  %v450_v22 = vld [vmem:[%s2576_s4 + $0x1e0] sm:$0xff] }
 0x1c5   :  { %2022 = vmatprep.subr.bf16.mxu0 %v2176_v34 }
 0x292   :  { %v1810_v29 = vpop.f32.mrb[4].mxu0 }
 0x293   :  { %v275_v30 = vpop.f32.mrb[5].mxu0 }
 0x294   :  { %1819 = vmatprep.mubr.msk.f32.mxu0 %vm121_vm1, %v275_v30  ;;  %v429_v30 = vld [vmem:[%s2576_s4 + $0x138] sm:$0xff] }
 0x295   :  { %1820 = vmatmul.mubr.msk.f32.vlgmr.msra.gmra.mrb[6].mxu0 %vm121_vm1, %v1810_v29  ;;  %v428_v29 = vld [vmem:[%s2576_s4 + $0x130] sm:$0xff] }
 0x296   :  { %2024 = vmatpush3.bf16.msra.mxu0 %v2023_v33  ;;  %1830 = vmatprep.mubr.msk.f32.mxu0 %vm2177_vm4, %v2178_v44  ;;  %v406_v33 = vld [vmem:[%s2576_s4 + $0x80] sm:$0xff]  ;;  %v2080_v36 = vpack.c.bf16 %v429_v30, %v428_v29 }
 0x297   :  { %2025 = vmatprep.subr.bf16.mxu0 %v2176_v34  ;;  %v2047_v39 = vpack.c.bf16 %v407_v35, %v406_v33  ;;  %v454_v33 = vld [vmem:[%s2577_s5] sm:$0x1] }
 0x29a   :  { %2027 = vmatpush3.bf16.msra.mxu0 %v2026_v40 }
 0x29b   :  { %2028 = vmatprep.subr.bf16.mxu0 %v2176_v34 }
 0x368   :  { %v1821_v46 = vpop.f32.mrb[6].mxu0 }
 0x369   :  { %v369_v47 = vpop.f32.mrb[7].mxu0  ;;  %v375_v1 = vadd.f32 %v1821_v46, %v1667_v45  ;;  %v432_v46 = vld [vmem:[%s2576_s4 + $0x150] sm:$0xff] }
 0x36a   :  { %v370_v48 = vadd.f32 %v1667_v45, %v369_v47  ;;  %v433_v47 = vld [vmem:[%s2576_s4 + $0x158] sm:$0xff] }
 0x36b   :  { %v381_v8 = vmul.f32 0.01, %v375_v1  ;;  %vm379_vm7 = vcmp.gt.f32.partialorder %v375_v1, 0.0  ;;  %v2086_v51 = vpack.c.bf16 %v433_v47, %v432_v46 }
 0x36c   :  { %vm378_vm5 = vcmp.gt.f32.partialorder %v370_v48, 0.0  ;;  %v380_v49 = vmul.f32 0.01, %v370_v48 }
 0x36d   :  { %v383_v17 = vsel %vm379_vm7, %v375_v1, %v381_v8  ;;  %v438_v1 = vld [vmem:[%s2576_s4 + $0x180] sm:$0xff] }
 0x36e   :  { %v382_v52 = vsel %vm378_vm5, %v370_v48, %v380_v49  ;;  %v387_v23 = vmul.f32 0.01, %v383_v17  ;;  %vm385_vm8 = vcmp.gt.f32.partialorder %v383_v17, 0.0  ;;  %v2050_v48 = vpack.c.bf16 %v409_v42, %v408_v41  ;;  %v410_v49 = vld [vmem:[%s2576_s4 + $0xa0] sm:$0xff] }
 0x36f   :  { %vm384_vm6 = vcmp.gt.f32.partialorder %v382_v52, 0.0  ;;  %v386_v55 = vmul.f32 0.01, %v382_v52  ;;  %v2053_v54 = vpack.c.bf16 %v411_v50, %v410_v49  ;;  %v442_v8 = vld [vmem:[%s2576_s4 + $0x1a0] sm:$0xff] }
 0x370   :  { %v2399_v31 = vsel %vm385_vm8, %v383_v17, %v387_v23  ;;  %v451_v23 = vld [vmem:[%s2576_s4 + $0x1e8] sm:$0xff] }
 0x371   :  { %v2317_v59 = vsel %vm384_vm6, %v382_v52, %v386_v55  ;;  %v1121_v45 = vrot.slane %v2399_v31, 1  ;;  %v434_v52 = vld [vmem:[%s2576_s4 + $0x160] sm:$0xff]  ;;  %v1269_v5 = vrot.slane %v2399_v31, 3  ;;  %v1343_v11 = vrot.slane %v2399_v31, 4 }
 0x372   :  { %1831 = vmatmul.mubr.msk.f32.vlgmr.msra.gmra.mrb[8].mxu0 %vm121_vm1, %v2317_v59  ;;  %v899_v61 = vrot.slane %v2317_v59, 6  ;;  %v529_v9 = vrot.slane %v2317_v59, 1  ;;  %v973_v13 = vrot.slane %v2317_v59, 7  ;;  %v603_v25 = vrot.slane %v2317_v59, 2 }
 0x373   :  { %2030 = vmatpush3.bf16.msra.mxu0 %v2029_v56  ;;  %1841 = vmatprep.mubr.msk.f32.mxu0 %vm2177_vm4, %v2178_v44  ;;  %v677_v40 = vrot.slane %v2317_v59, 3  ;;  %v751_v55 = vrot.slane %v2317_v59, 4  ;;  %v412_v56 = vld [vmem:[%s2576_s4 + $0xb0] sm:$0xff]  ;;  %v2089_v58 = vpack.c.bf16 %v435_v53, %v434_v52  ;;  %v825_v3 = vrot.slane %v2317_v59, 5 }
 0x374   :  { %1897 = vmatmul.mubr.msk.f32.vlgmr.msra.gmra.mrb[0].mxu1 %vm121_vm1, %v899_v61  ;;  %2031 = vmatprep.subr.bf16.mxu0 %v2176_v34  ;;  %v436_v61 = vld [vmem:[%s2576_s4 + $0x170] sm:$0xff]  ;;  %v2056_v63 = vpack.c.bf16 %v413_v57, %v412_v56  ;;  %v1417_v18 = vrot.slane %v2399_v31, 5  ;;  %v1565_v29 = vrot.slane %v2399_v31, 7 }
 0x375   :  { %2066 = vmatpush3.bf16.msra.mxu1 %v2065_v60  ;;  %1907 = vmatprep.mubr.msk.f32.mxu1 %vm2177_vm4, %v2178_v44  ;;  %v1195_v60 = vrot.slane %v2399_v31, 2 }
 0x376   :  { %2067 = vmatprep.subr.bf16.mxu1 %v2176_v34 }
 0x377   :  { %2033 = vmatpush3.bf16.msra.mxu0 %v2032_v0  ;;  %v2092_v0 = vpack.c.bf16 %v437_v62, %v436_v61 }
 0x378   :  { %2034 = vmatprep.subr.bf16.mxu0 %v2176_v34 }
 0x379   :  { %2069 = vmatpush3.bf16.msra.mxu1 %v2068_v4  ;;  %v2095_v4 = vpack.c.bf16 %v439_v2, %v438_v1 }
 0x37a   :  { %1842 = vmatmul.mubr.msk.f32.vlgmr.msra.gmra.mrb[8].mxu0 %vm121_vm1, %v529_v9  ;;  %2070 = vmatprep.subr.bf16.mxu1 %v2176_v34  ;;  %v443_v9 = vld [vmem:[%s2576_s4 + $0x1a8] sm:$0xff] }
 0x37b   :  { %2036 = vmatpush3.bf16.msra.mxu0 %v2035_v7  ;;  %1852 = vmatprep.mubr.msk.f32.mxu0 %vm2177_vm4, %v2178_v44  ;;  %v441_v7 = vld [vmem:[%s2576_s4 + $0x198] sm:$0xff]  ;;  %v2101_v10 = vpack.c.bf16 %v443_v9, %v442_v8 }
 0x37c   :  { %1908 = vmatmul.mubr.msk.f32.vlgmr.msra.gmra.mrb[0].mxu1 %vm121_vm1, %v973_v13  ;;  %2037 = vmatprep.subr.bf16.mxu0 %v2176_v34  ;;  %v2098_v59 = vpack.c.bf16 %v441_v7, %v440_v6  ;;  %v445_v13 = vld [vmem:[%s2576_s4 + $0x1b8] sm:$0xff] }
 0x37d   :  { %2072 = vmatpush3.bf16.msra.mxu1 %v2071_v12  ;;  %1918 = vmatprep.mubr.msk.f32.mxu1 %vm2177_vm4, %v2178_v44  ;;  %v444_v12 = vld [vmem:[%s2576_s4 + $0x1b0] sm:$0xff] }
 0x37e   :  { %2073 = vmatprep.subr.bf16.mxu1 %v2176_v34  ;;  %v2104_v14 = vpack.c.bf16 %v445_v13, %v444_v12 }
 0x37f   :  { %2039 = vmatpush3.bf16.msra.mxu0 %v2038_v16  ;;  %v447_v16 = vld [vmem:[%s2576_s4 + $0x1c8] sm:$0xff] }
 0x380   :  { %2040 = vmatprep.subr.bf16.mxu0 %v2176_v34  ;;  %v2107_v17 = vpack.c.bf16 %v447_v16, %v446_v15 }
 0x381   :  { %2075 = vmatpush3.bf16.msra.mxu1 %v2074_v20  ;;  %v449_v20 = vld [vmem:[%s2576_s4 + $0x1d8] sm:$0xff]  ;;  %s2179_s4 = smov [#allocation2]  }
 0x382   :  { %1853 = vmatmul.mubr.msk.f32.vlgmr.msra.gmra.mrb[8].mxu0 %vm121_vm1, %v603_v25  ;;  %2076 = vmatprep.subr.bf16.mxu1 %v2176_v34  ;;  %v2110_v21 = vpack.c.bf16 %v449_v20, %v448_v19  ;;  %v1491_v25 = vrot.slane %v2399_v31, 6  ;;  %s1647_s14 = sshll.u32 %s2179_s4, 4  ;;  %s1648_s14 = int_to_ptr.vmem [resolvable:$true] %s1647_s14 }
 0x383   :  { %2042 = vmatpush3.bf16.msra.mxu0 %v2041_v24  ;;  %1863 = vmatprep.mubr.msk.f32.mxu0 %vm2177_vm4, %v2178_v44  ;;  %v2113_v24 = vpack.c.bf16 %v451_v23, %v450_v22  ;;  %s2152_s15 = scalar_lea.vmem %s1648_s14, 16  ;;  %s2156_s16 = scalar_lea.vmem %s1648_s14, 32 }
 0x384   :  { %1919 = vmatmul.mubr.msk.f32.vlgmr.msra.gmra.mrb[0].mxu1 %vm121_vm1, %v2399_v31  ;;  %2043 = vmatprep.subr.bf16.mxu0 %v2176_v34  ;;  %p2153_p0 = scmp.ne.s32.totalorder %s1648_s14, %s2152_s15  ;;  %p2157_p1 = scmp.lt.s32.totalorder %s1648_s14, %s1648_s14 }
 0x385   :  { %2078 = vmatpush3.bf16.msra.mxu1 %v2077_v28  ;;  %1929 = vmatprep.mubr.msk.f32.mxu1 %vm2177_vm4, %v2178_v44  ;;  %v2116_v28 = vpack.c.bf16 %v453_v27, %v452_v26  ;;  %p2158_p2 = scmp.lt.s32.totalorder %s2156_s16, %s2152_s15 }
 0x386   :  { %2079 = vmatprep.subr.bf16.mxu1 %v2176_v34 }
 0x387   :  { %2045 = vmatpush3.bf16.msra.mxu0 %v2044_v32  ;;  %p2159_p3 = por %p2158_p2, %p2157_p1 }
 0x388   :  { %2046 = vmatprep.subr.bf16.mxu0 %v2176_v34 }
 0x389   :  { %2081 = vmatpush3.bf16.msra.mxu1 %v2080_v36  ;;  %p2160_p4 = pnand %p2159_p3, %p2153_p0 }
 0x38a   :  { %1864 = vmatmul.mubr.msk.f32.vlgmr.msra.gmra.mrb[8].mxu0 %vm121_vm1, %v677_v40  ;;  %2082 = vmatprep.subr.bf16.mxu1 %v2176_v34 }
 0x38b   :  { %2048 = vmatpush3.bf16.msra.mxu0 %v2047_v39  ;;  %1874 = vmatprep.mubr.msk.f32.mxu0 %vm2177_vm4, %v2178_v44 }
 0x38c   :  { %1930 = vmatmul.mubr.msk.f32.vlgmr.msra.gmra.mrb[0].mxu1 %vm121_vm1, %v1121_v45  ;;  %2049 = vmatprep.subr.bf16.mxu0 %v2176_v34 }
 0x38d   :  { %2084 = vmatpush3.bf16.msra.mxu1 %v2083_v43  ;;  %1940 = vmatprep.mubr.msk.f32.mxu1 %vm2177_vm4, %v2178_v44 }
 0x38e   :  { %2085 = vmatprep.subr.bf16.mxu1 %v2176_v34 }
 0x38f   :  { %2051 = vmatpush3.bf16.msra.mxu0 %v2050_v48 }
 0x390   :  { %2052 = vmatprep.subr.bf16.mxu0 %v2176_v34 }
 0x391   :  { %2087 = vmatpush3.bf16.msra.mxu1 %v2086_v51 }
 0x392   :  { %1875 = vmatmul.mubr.msk.f32.vlgmr.msra.gmra.mrb[8].mxu0 %vm121_vm1, %v751_v55  ;;  %2088 = vmatprep.subr.bf16.mxu1 %v2176_v34 }
 0x393   :  { %2054 = vmatpush3.bf16.msra.mxu0 %v2053_v54  ;;  %1885 = vmatprep.mubr.msk.f32.mxu0 %vm2177_vm4, %v2178_v44 }
 0x394   :  { %1941 = vmatmul.mubr.msk.f32.vlgmr.msra.gmra.mrb[0].mxu1 %vm121_vm1, %v1195_v60  ;;  %2055 = vmatprep.subr.bf16.mxu0 %v2176_v34 }
 0x395   :  { %2090 = vmatpush3.bf16.msra.mxu1 %v2089_v58  ;;  %1951 = vmatprep.mubr.msk.f32.mxu1 %vm2177_vm4, %v2178_v44 }
 0x396   :  { %2091 = vmatprep.subr.bf16.mxu1 %v2176_v34 }
 0x397   :  { %2057 = vmatpush3.bf16.msra.mxu0 %v2056_v63 }
 0x399   :  { %2093 = vmatpush3.bf16.msra.mxu1 %v2092_v0 }
 0x39a   :  { %1886 = vmatmul.mubr.msk.f32.vlgmr.msra.gmra.mrb[8].mxu0 %vm121_vm1, %v825_v3  ;;  %2094 = vmatprep.subr.bf16.mxu1 %v2176_v34 }
 0x39c   :  { %1952 = vmatmul.mubr.msk.f32.vlgmr.msra.gmra.mrb[0].mxu1 %vm121_vm1, %v1269_v5 }
 0x39d   :  { %2096 = vmatpush3.bf16.msra.mxu1 %v2095_v4  ;;  %1962 = vmatprep.mubr.msk.f32.mxu1 %vm2177_vm4, %v2178_v44 }
 0x39e   :  { %2097 = vmatprep.subr.bf16.mxu1 %v2176_v34 }
 0x3a1   :  { %2099 = vmatpush3.bf16.msra.mxu1 %v2098_v59 }
 0x3a2   :  { %2100 = vmatprep.subr.bf16.mxu1 %v2176_v34 }
 0x3a4   :  { %1963 = vmatmul.mubr.msk.f32.vlgmr.msra.gmra.mrb[0].mxu1 %vm121_vm1, %v1343_v11 }
 0x3a5   :  { %2102 = vmatpush3.bf16.msra.mxu1 %v2101_v10  ;;  %1973 = vmatprep.mubr.msk.f32.mxu1 %vm2177_vm4, %v2178_v44 }
 0x3a6   :  { %2103 = vmatprep.subr.bf16.mxu1 %v2176_v34 }
 0x3a9   :  { %2105 = vmatpush3.bf16.msra.mxu1 %v2104_v14 }
 0x3aa   :  { %2106 = vmatprep.subr.bf16.mxu1 %v2176_v34 }
 0x3ac   :  { %1974 = vmatmul.mubr.msk.f32.vlgmr.msra.gmra.mrb[0].mxu1 %vm121_vm1, %v1417_v18 }
 0x3ad   :  { %2108 = vmatpush3.bf16.msra.mxu1 %v2107_v17  ;;  %1984 = vmatprep.mubr.msk.f32.mxu1 %vm2177_vm4, %v2178_v44 }
 0x3ae   :  { %2109 = vmatprep.subr.bf16.mxu1 %v2176_v34 }
 0x3b1   :  { %2111 = vmatpush3.bf16.msra.mxu1 %v2110_v21 }
 0x3b2   :  { %2112 = vmatprep.subr.bf16.mxu1 %v2176_v34 }
 0x3b4   :  { %1985 = vmatmul.mubr.msk.f32.vlgmr.msra.gmra.mrb[0].mxu1 %vm121_vm1, %v1491_v25 }
 0x3b5   :  { %2114 = vmatpush3.bf16.msra.mxu1 %v2113_v24  ;;  %1995 = vmatprep.mubr.msk.f32.mxu1 %vm2177_vm4, %v2178_v44 }
 0x3b6   :  { %2115 = vmatprep.subr.bf16.mxu1 %v2176_v34 }
 0x3b9   :  { %2117 = vmatpush3.bf16.msra.mxu1 %v2116_v28 }
 0x3bc   :  { %1996 = vmatmul.mubr.msk.f32.vlgmr.msra.gmra.mrb[0].mxu1 %vm121_vm1, %v1565_v29 }
 0x46d   :  { %v894_v30 = vpop.f32.mrb[8].mxu0 }
 0x46e   :  { %v1887_v32 = vpop.f32.mrb[9].mxu0  ;;  %v2118_v35 = vadd.f32 %v894_v30, %v454_v33 }
 0x48f   :  { %v1634_v36 = vpop.f32.mrb[0].mxu1 }
 0x490   :  { %v2119_v37 = vadd.f32 %v2118_v35, %v1634_v36  ;;  %v1997_v44 = vpop.f32.mrb[1].mxu1 }
 0x492   :  { %1640 = vst.msk [vmem:[#allocation2] sm:$0x1] %vm1639_vm9, %v2119_v37 }
 0x493   :  { %2163 = shalt.err (!%p2160_p4)
}
 0x494   :  { %s2164_s5 = scalar_lea.hbm %s2578_s6, 16 }
 0x495   :  { %p2165_p5 = scmp.ne.s32.totalorder %s2578_s6, %s2164_s5  ;;  %p2168_p6 = scmp.lt.u32.totalorder %s2164_s5, %s2578_s6 }
 0x497   :  { %p2170_p7 = pnand %p2168_p6, %p2165_p5 }
 0x499   :  { %2173 = shalt.err (!%p2170_p7)
}
 0x49a   :  { %1650 = dma.vmem_to_hbm [thread:$0]  %s1648_s14, 16, %s2578_s6, [#allocation3]  }
 0x49b   :  { %2174 = dma.done.wait [#allocation3], 16  }
 0x49c   :  { %2175 = vsyncadd [#allocation3], 4294967280 }
 0x49d   :  { %1654 = vsyncpa [#allocation3], 1 }

</bundles_post_ra>
